<compile_context>
chip_gen: v7x
topology: tpu7x:2x2x1
jax: 0.10.0
libtpu: 0.0.40
codegen_flags: <defaults>
</compile_context>

<pallas_src>
import functools

import jax
import jax.numpy as jnp
import numpy as np
from jax.experimental import pallas as pl
from jax.experimental.pallas import tpu as pltpu


def _patchify_kernel(x_ref, o_ref, *, n_patches, patch_size):
    # x_ref: (1, 1, H, W)           -- image plane for (batch b, channel c)
    # o_ref: (1, n_tok, 1, ps, ps)  -- all tokens of that (b, c) pair
    ps = patch_size
    for i in range(n_patches):
        for j in range(n_patches):
            t = i * n_patches + j
            o_ref[0, t, 0, :, :] = x_ref[
                0, 0, i * ps:(i + 1) * ps, j * ps:(j + 1) * ps
            ]


def patchify(images, n_patches):
    B, C, H, W = images.shape
    assert H == W, "Patchify only supports square images"
    assert H % n_patches == 0, "Image size must be divisible by n_patches"
    ps = H // n_patches
    n_tok = n_patches * n_patches
    patch_dim = C * ps * ps

    kernel = functools.partial(
        _patchify_kernel, n_patches=n_patches, patch_size=ps
    )

    out5 = pl.pallas_call(
        kernel,
        out_shape=jax.ShapeDtypeStruct((B, n_tok, C, ps, ps), images.dtype),
        grid=(B, C),
        in_specs=[
            # One full (H, W) plane per grid step; last two dims == full dims.
            pl.BlockSpec((1, 1, H, W), lambda b, c: (b, c, 0, 0)),
        ],
        # Channel-c slab of every token; last two dims == full dims (ps, ps).
        out_specs=pl.BlockSpec(
            (1, n_tok, 1, ps, ps), lambda b, c: (b, 0, c, 0, 0)
        ),
        compiler_params=pltpu.CompilerParams(
            dimension_semantics=("parallel", "parallel")
        ),
    )(images)

    # (B, n_tok, C, ps, ps) is bit-identical (row-major) to
    # (B, n_tok, C*ps*ps) with the PyTorch (C, ph, pw) flatten order.
    return out5.reshape(B, n_tok, patch_dim)


def _reference_patchify(images_np, n_patches):
    """Direct NumPy port of the PyTorch loops (ground truth)."""
    B, C, H, W = images_np.shape
    ps = H // n_patches
    out = np.zeros((B, n_patches * n_patches, ps * ps * C), dtype=np.float32)
    for b in range(B):
        for i in range(n_patches):
            for j in range(n_patches):
                patch = images_np[b, :, i * ps:(i + 1) * ps, j * ps:(j + 1) * ps]
                out[b, i * n_patches + j] = patch.reshape(-1)
    return out


if __name__ == "__main__":
    key = jax.random.PRNGKey(0)
    # Small shapes consistent with the module: B=2, C=4, H=W=16, n_patches=4
    # -> output (2, 16, 64). (Patchify has no learned parameters.)
    B, C, H, W = 2, 4, 16, 16
    n_patches = 4
    images = jax.random.normal(key, (B, C, H, W), dtype=jnp.float32)

    out = patchify(images, n_patches)
    out = jax.block_until_ready(out)

    ref = _reference_patchify(np.asarray(images), n_patches)
    assert out.shape == ref.shape, (out.shape, ref.shape)
    np.testing.assert_allclose(np.asarray(out), ref, atol=1e-6, rtol=1e-6)
    print("KERNEL_OK")
</pallas_src>

<mosaic_0001>
module attributes {stable_mosaic.version = 11 : i64} {
  func.func @_patchify_kernel(%arg0: i32, %arg1: i32, %arg2: memref<1x1x16x16xf32, #tpu.memory_space<vmem>>, %arg3: memref<1x16x1x4x4xf32, #tpu.memory_space<vmem>>) attributes {dimension_semantics = [#tpu.dimension_semantics<parallel>, #tpu.dimension_semantics<parallel>], iteration_bounds = array<i64: 2, 4>, scalar_prefetch = 0 : i64, scratch_operands = 0 : i64, tpu.core_type = #tpu.core_type<tc>, window_params = [{transform_indices = @transform_0, window_bounds = array<i64: 1, 1, 16, 16>}, {transform_indices = @transform_1, window_bounds = array<i64: 1, 16, 1, 4, 4>}]} {
    %c0 = arith.constant 0 : index
    %c0_0 = arith.constant 0 : index
    %c0_1 = arith.constant 0 : index
    %c0_2 = arith.constant 0 : index
    %0 = vector.load %arg2[%c0, %c0_0, %c0_1, %c0_2] : memref<1x1x16x16xf32, #tpu.memory_space<vmem>>, vector<1x1x4x4xf32>
    %1 = vector.shape_cast %0 : vector<1x1x4x4xf32> to vector<4x4xf32>
    %c0_3 = arith.constant 0 : index
    %c0_4 = arith.constant 0 : index
    %c0_5 = arith.constant 0 : index
    %c0_6 = arith.constant 0 : index
    %c0_7 = arith.constant 0 : index
    %2 = vector.load %arg3[%c0_3, %c0_4, %c0_5, %c0_6, %c0_7] : memref<1x16x1x4x4xf32, #tpu.memory_space<vmem>>, vector<1x1x1x4x4xf32>
    %3 = vector.shape_cast %2 : vector<1x1x1x4x4xf32> to vector<4x4xf32>
    %4 = vector.shape_cast %1 : vector<4x4xf32> to vector<1x1x1x4x4xf32>
    tpu.vector_store %arg3[%c0_3, %c0_4, %c0_5, %c0_6, %c0_7], %4 {strides = array<i32>} : memref<1x16x1x4x4xf32, #tpu.memory_space<vmem>>, vector<1x1x1x4x4xf32>,
    %c0_8 = arith.constant 0 : index
    %c0_9 = arith.constant 0 : index
    %c0_10 = arith.constant 0 : index
    %c4 = arith.constant 4 : index
    %5 = vector.load %arg2[%c0_8, %c0_9, %c0_10, %c4] : memref<1x1x16x16xf32, #tpu.memory_space<vmem>>, vector<1x1x4x4xf32>
    %6 = vector.shape_cast %5 : vector<1x1x4x4xf32> to vector<4x4xf32>
    %c0_11 = arith.constant 0 : index
    %c1 = arith.constant 1 : index
    %c0_12 = arith.constant 0 : index
    %c0_13 = arith.constant 0 : index
    %c0_14 = arith.constant 0 : index
    %7 = vector.load %arg3[%c0_11, %c1, %c0_12, %c0_13, %c0_14] : memref<1x16x1x4x4xf32, #tpu.memory_space<vmem>>, vector<1x1x1x4x4xf32>
    %8 = vector.shape_cast %7 : vector<1x1x1x4x4xf32> to vector<4x4xf32>
    %9 = vector.shape_cast %6 : vector<4x4xf32> to vector<1x1x1x4x4xf32>
    tpu.vector_store %arg3[%c0_11, %c1, %c0_12, %c0_13, %c0_14], %9 {strides = array<i32>} : memref<1x16x1x4x4xf32, #tpu.memory_space<vmem>>, vector<1x1x1x4x4xf32>,
    %c0_15 = arith.constant 0 : index
    %c0_16 = arith.constant 0 : index
    %c0_17 = arith.constant 0 : index
    %c8 = arith.constant 8 : index
    %10 = vector.load %arg2[%c0_15, %c0_16, %c0_17, %c8] : memref<1x1x16x16xf32, #tpu.memory_space<vmem>>, vector<1x1x4x4xf32>
    %11 = vector.shape_cast %10 : vector<1x1x4x4xf32> to vector<4x4xf32>
    %c0_18 = arith.constant 0 : index
    %c2 = arith.constant 2 : index
    %c0_19 = arith.constant 0 : index
    %c0_20 = arith.constant 0 : index
    %c0_21 = arith.constant 0 : index
    %12 = vector.load %arg3[%c0_18, %c2, %c0_19, %c0_20, %c0_21] : memref<1x16x1x4x4xf32, #tpu.memory_space<vmem>>, vector<1x1x1x4x4xf32>
    %13 = vector.shape_cast %12 : vector<1x1x1x4x4xf32> to vector<4x4xf32>
    %14 = vector.shape_cast %11 : vector<4x4xf32> to vector<1x1x1x4x4xf32>
    tpu.vector_store %arg3[%c0_18, %c2, %c0_19, %c0_20, %c0_21], %14 {strides = array<i32>} : memref<1x16x1x4x4xf32, #tpu.memory_space<vmem>>, vector<1x1x1x4x4xf32>,
    %c0_22 = arith.constant 0 : index
    %c0_23 = arith.constant 0 : index
    %c0_24 = arith.constant 0 : index
    %c12 = arith.constant 12 : index
    %15 = vector.load %arg2[%c0_22, %c0_23, %c0_24, %c12] : memref<1x1x16x16xf32, #tpu.memory_space<vmem>>, vector<1x1x4x4xf32>
    %16 = vector.shape_cast %15 : vector<1x1x4x4xf32> to vector<4x4xf32>
    %c0_25 = arith.constant 0 : index
    %c3 = arith.constant 3 : index
    %c0_26 = arith.constant 0 : index
    %c0_27 = arith.constant 0 : index
    %c0_28 = arith.constant 0 : index
    %17 = vector.load %arg3[%c0_25, %c3, %c0_26, %c0_27, %c0_28] : memref<1x16x1x4x4xf32, #tpu.memory_space<vmem>>, vector<1x1x1x4x4xf32>
    %18 = vector.shape_cast %17 : vector<1x1x1x4x4xf32> to vector<4x4xf32>
    %19 = vector.shape_cast %16 : vector<4x4xf32> to vector<1x1x1x4x4xf32>
    tpu.vector_store %arg3[%c0_25, %c3, %c0_26, %c0_27, %c0_28], %19 {strides = array<i32>} : memref<1x16x1x4x4xf32, #tpu.memory_space<vmem>>, vector<1x1x1x4x4xf32>,
    %c0_29 = arith.constant 0 : index
    %c0_30 = arith.constant 0 : index
    %c4_31 = arith.constant 4 : index
    %c0_32 = arith.constant 0 : index
    %20 = vector.load %arg2[%c0_29, %c0_30, %c4_31, %c0_32] : memref<1x1x16x16xf32, #tpu.memory_space<vmem>>, vector<1x1x4x4xf32>
    %21 = vector.shape_cast %20 : vector<1x1x4x4xf32> to vector<4x4xf32>
    %c0_33 = arith.constant 0 : index
    %c4_34 = arith.constant 4 : index
    %c0_35 = arith.constant 0 : index
    %c0_36 = arith.constant 0 : index
    %c0_37 = arith.constant 0 : index
    %22 = vector.load %arg3[%c0_33, %c4_34, %c0_35, %c0_36, %c0_37] : memref<1x16x1x4x4xf32, #tpu.memory_space<vmem>>, vector<1x1x1x4x4xf32>
    %23 = vector.shape_cast %22 : vector<1x1x1x4x4xf32> to vector<4x4xf32>
    %24 = vector.shape_cast %21 : vector<4x4xf32> to vector<1x1x1x4x4xf32>
    tpu.vector_store %arg3[%c0_33, %c4_34, %c0_35, %c0_36, %c0_37], %24 {strides = array<i32>} : memref<1x16x1x4x4xf32, #tpu.memory_space<vmem>>, vector<1x1x1x4x4xf32>,
    %c0_38 = arith.constant 0 : index
    %c0_39 = arith.constant 0 : index
    %c4_40 = arith.constant 4 : index
    %c4_41 = arith.constant 4 : index
    %25 = vector.load %arg2[%c0_38, %c0_39, %c4_40, %c4_41] : memref<1x1x16x16xf32, #tpu.memory_space<vmem>>, vector<1x1x4x4xf32>
    %26 = vector.shape_cast %25 : vector<1x1x4x4xf32> to vector<4x4xf32>
    %c0_42 = arith.constant 0 : index
    %c5 = arith.constant 5 : index
    %c0_43 = arith.constant 0 : index
    %c0_44 = arith.constant 0 : index
    %c0_45 = arith.constant 0 : index
    %27 = vector.load %arg3[%c0_42, %c5, %c0_43, %c0_44, %c0_45] : memref<1x16x1x4x4xf32, #tpu.memory_space<vmem>>, vector<1x1x1x4x4xf32>
    %28 = vector.shape_cast %27 : vector<1x1x1x4x4xf32> to vector<4x4xf32>
    %29 = vector.shape_cast %26 : vector<4x4xf32> to vector<1x1x1x4x4xf32>
    tpu.vector_store %arg3[%c0_42, %c5, %c0_43, %c0_44, %c0_45], %29 {strides = array<i32>} : memref<1x16x1x4x4xf32, #tpu.memory_space<vmem>>, vector<1x1x1x4x4xf32>,
    %c0_46 = arith.constant 0 : index
    %c0_47 = arith.constant 0 : index
    %c4_48 = arith.constant 4 : index
    %c8_49 = arith.constant 8 : index
    %30 = vector.load %arg2[%c0_46, %c0_47, %c4_48, %c8_49] : memref<1x1x16x16xf32, #tpu.memory_space<vmem>>, vector<1x1x4x4xf32>
    %31 = vector.shape_cast %30 : vector<1x1x4x4xf32> to vector<4x4xf32>
    %c0_50 = arith.constant 0 : index
    %c6 = arith.constant 6 : index
    %c0_51 = arith.constant 0 : index
    %c0_52 = arith.constant 0 : index
    %c0_53 = arith.constant 0 : index
    %32 = vector.load %arg3[%c0_50, %c6, %c0_51, %c0_52, %c0_53] : memref<1x16x1x4x4xf32, #tpu.memory_space<vmem>>, vector<1x1x1x4x4xf32>
    %33 = vector.shape_cast %32 : vector<1x1x1x4x4xf32> to vector<4x4xf32>
    %34 = vector.shape_cast %31 : vector<4x4xf32> to vector<1x1x1x4x4xf32>
    tpu.vector_store %arg3[%c0_50, %c6, %c0_51, %c0_52, %c0_53], %34 {strides = array<i32>} : memref<1x16x1x4x4xf32, #tpu.memory_space<vmem>>, vector<1x1x1x4x4xf32>,
    %c0_54 = arith.constant 0 : index
    %c0_55 = arith.constant 0 : index
    %c4_56 = arith.constant 4 : index
    %c12_57 = arith.constant 12 : index
    %35 = vector.load %arg2[%c0_54, %c0_55, %c4_56, %c12_57] : memref<1x1x16x16xf32, #tpu.memory_space<vmem>>, vector<1x1x4x4xf32>
    %36 = vector.shape_cast %35 : vector<1x1x4x4xf32> to vector<4x4xf32>
    %c0_58 = arith.constant 0 : index
    %c7 = arith.constant 7 : index
    %c0_59 = arith.constant 0 : index
    %c0_60 = arith.constant 0 : index
    %c0_61 = arith.constant 0 : index
    %37 = vector.load %arg3[%c0_58, %c7, %c0_59, %c0_60, %c0_61] : memref<1x16x1x4x4xf32, #tpu.memory_space<vmem>>, vector<1x1x1x4x4xf32>
    %38 = vector.shape_cast %37 : vector<1x1x1x4x4xf32> to vector<4x4xf32>
    %39 = vector.shape_cast %36 : vector<4x4xf32> to vector<1x1x1x4x4xf32>
    tpu.vector_store %arg3[%c0_58, %c7, %c0_59, %c0_60, %c0_61], %39 {strides = array<i32>} : memref<1x16x1x4x4xf32, #tpu.memory_space<vmem>>, vector<1x1x1x4x4xf32>,
    %c0_62 = arith.constant 0 : index
    %c0_63 = arith.constant 0 : index
    %c8_64 = arith.constant 8 : index
    %c0_65 = arith.constant 0 : index
    %40 = vector.load %arg2[%c0_62, %c0_63, %c8_64, %c0_65] : memref<1x1x16x16xf32, #tpu.memory_space<vmem>>, vector<1x1x4x4xf32>
    %41 = vector.shape_cast %40 : vector<1x1x4x4xf32> to vector<4x4xf32>
    %c0_66 = arith.constant 0 : index
    %c8_67 = arith.constant 8 : index
    %c0_68 = arith.constant 0 : index
    %c0_69 = arith.constant 0 : index
    %c0_70 = arith.constant 0 : index
    %42 = vector.load %arg3[%c0_66, %c8_67, %c0_68, %c0_69, %c0_70] : memref<1x16x1x4x4xf32, #tpu.memory_space<vmem>>, vector<1x1x1x4x4xf32>
    %43 = vector.shape_cast %42 : vector<1x1x1x4x4xf32> to vector<4x4xf32>
    %44 = vector.shape_cast %41 : vector<4x4xf32> to vector<1x1x1x4x4xf32>
    tpu.vector_store %arg3[%c0_66, %c8_67, %c0_68, %c0_69, %c0_70], %44 {strides = array<i32>} : memref<1x16x1x4x4xf32, #tpu.memory_space<vmem>>, vector<1x1x1x4x4xf32>,
    %c0_71 = arith.constant 0 : index
    %c0_72 = arith.constant 0 : index
    %c8_73 = arith.constant 8 : index
    %c4_74 = arith.constant 4 : index
    %45 = vector.load %arg2[%c0_71, %c0_72, %c8_73, %c4_74] : memref<1x1x16x16xf32, #tpu.memory_space<vmem>>, vector<1x1x4x4xf32>
    %46 = vector.shape_cast %45 : vector<1x1x4x4xf32> to vector<4x4xf32>
    %c0_75 = arith.constant 0 : index
    %c9 = arith.constant 9 : index
    %c0_76 = arith.constant 0 : index
    %c0_77 = arith.constant 0 : index
    %c0_78 = arith.constant 0 : index
    %47 = vector.load %arg3[%c0_75, %c9, %c0_76, %c0_77, %c0_78] : memref<1x16x1x4x4xf32, #tpu.memory_space<vmem>>, vector<1x1x1x4x4xf32>
    %48 = vector.shape_cast %47 : vector<1x1x1x4x4xf32> to vector<4x4xf32>
    %49 = vector.shape_cast %46 : vector<4x4xf32> to vector<1x1x1x4x4xf32>
    tpu.vector_store %arg3[%c0_75, %c9, %c0_76, %c0_77, %c0_78], %49 {strides = array<i32>} : memref<1x16x1x4x4xf32, #tpu.memory_space<vmem>>, vector<1x1x1x4x4xf32>,
    %c0_79 = arith.constant 0 : index
    %c0_80 = arith.constant 0 : index
    %c8_81 = arith.constant 8 : index
    %c8_82 = arith.constant 8 : index
    %50 = vector.load %arg2[%c0_79, %c0_80, %c8_81, %c8_82] : memref<1x1x16x16xf32, #tpu.memory_space<vmem>>, vector<1x1x4x4xf32>
    %51 = vector.shape_cast %50 : vector<1x1x4x4xf32> to vector<4x4xf32>
    %c0_83 = arith.constant 0 : index
    %c10 = arith.constant 10 : index
    %c0_84 = arith.constant 0 : index
    %c0_85 = arith.constant 0 : index
    %c0_86 = arith.constant 0 : index
    %52 = vector.load %arg3[%c0_83, %c10, %c0_84, %c0_85, %c0_86] : memref<1x16x1x4x4xf32, #tpu.memory_space<vmem>>, vector<1x1x1x4x4xf32>
    %53 = vector.shape_cast %52 : vector<1x1x1x4x4xf32> to vector<4x4xf32>
    %54 = vector.shape_cast %51 : vector<4x4xf32> to vector<1x1x1x4x4xf32>
    tpu.vector_store %arg3[%c0_83, %c10, %c0_84, %c0_85, %c0_86], %54 {strides = array<i32>} : memref<1x16x1x4x4xf32, #tpu.memory_space<vmem>>, vector<1x1x1x4x4xf32>,
    %c0_87 = arith.constant 0 : index
    %c0_88 = arith.constant 0 : index
    %c8_89 = arith.constant 8 : index
    %c12_90 = arith.constant 12 : index
    %55 = vector.load %arg2[%c0_87, %c0_88, %c8_89, %c12_90] : memref<1x1x16x16xf32, #tpu.memory_space<vmem>>, vector<1x1x4x4xf32>
    %56 = vector.shape_cast %55 : vector<1x1x4x4xf32> to vector<4x4xf32>
    %c0_91 = arith.constant 0 : index
    %c11 = arith.constant 11 : index
    %c0_92 = arith.constant 0 : index
    %c0_93 = arith.constant 0 : index
    %c0_94 = arith.constant 0 : index
    %57 = vector.load %arg3[%c0_91, %c11, %c0_92, %c0_93, %c0_94] : memref<1x16x1x4x4xf32, #tpu.memory_space<vmem>>, vector<1x1x1x4x4xf32>
    %58 = vector.shape_cast %57 : vector<1x1x1x4x4xf32> to vector<4x4xf32>
    %59 = vector.shape_cast %56 : vector<4x4xf32> to vector<1x1x1x4x4xf32>
    tpu.vector_store %arg3[%c0_91, %c11, %c0_92, %c0_93, %c0_94], %59 {strides = array<i32>} : memref<1x16x1x4x4xf32, #tpu.memory_space<vmem>>, vector<1x1x1x4x4xf32>,
    %c0_95 = arith.constant 0 : index
    %c0_96 = arith.constant 0 : index
    %c12_97 = arith.constant 12 : index
    %c0_98 = arith.constant 0 : index
    %60 = vector.load %arg2[%c0_95, %c0_96, %c12_97, %c0_98] : memref<1x1x16x16xf32, #tpu.memory_space<vmem>>, vector<1x1x4x4xf32>
    %61 = vector.shape_cast %60 : vector<1x1x4x4xf32> to vector<4x4xf32>
    %c0_99 = arith.constant 0 : index
    %c12_100 = arith.constant 12 : index
    %c0_101 = arith.constant 0 : index
    %c0_102 = arith.constant 0 : index
    %c0_103 = arith.constant 0 : index
    %62 = vector.load %arg3[%c0_99, %c12_100, %c0_101, %c0_102, %c0_103] : memref<1x16x1x4x4xf32, #tpu.memory_space<vmem>>, vector<1x1x1x4x4xf32>
    %63 = vector.shape_cast %62 : vector<1x1x1x4x4xf32> to vector<4x4xf32>
    %64 = vector.shape_cast %61 : vector<4x4xf32> to vector<1x1x1x4x4xf32>
    tpu.vector_store %arg3[%c0_99, %c12_100, %c0_101, %c0_102, %c0_103], %64 {strides = array<i32>} : memref<1x16x1x4x4xf32, #tpu.memory_space<vmem>>, vector<1x1x1x4x4xf32>,
    %c0_104 = arith.constant 0 : index
    %c0_105 = arith.constant 0 : index
    %c12_106 = arith.constant 12 : index
    %c4_107 = arith.constant 4 : index
    %65 = vector.load %arg2[%c0_104, %c0_105, %c12_106, %c4_107] : memref<1x1x16x16xf32, #tpu.memory_space<vmem>>, vector<1x1x4x4xf32>
    %66 = vector.shape_cast %65 : vector<1x1x4x4xf32> to vector<4x4xf32>
    %c0_108 = arith.constant 0 : index
    %c13 = arith.constant 13 : index
    %c0_109 = arith.constant 0 : index
    %c0_110 = arith.constant 0 : index
    %c0_111 = arith.constant 0 : index
    %67 = vector.load %arg3[%c0_108, %c13, %c0_109, %c0_110, %c0_111] : memref<1x16x1x4x4xf32, #tpu.memory_space<vmem>>, vector<1x1x1x4x4xf32>
    %68 = vector.shape_cast %67 : vector<1x1x1x4x4xf32> to vector<4x4xf32>
    %69 = vector.shape_cast %66 : vector<4x4xf32> to vector<1x1x1x4x4xf32>
    tpu.vector_store %arg3[%c0_108, %c13, %c0_109, %c0_110, %c0_111], %69 {strides = array<i32>} : memref<1x16x1x4x4xf32, #tpu.memory_space<vmem>>, vector<1x1x1x4x4xf32>,
    %c0_112 = arith.constant 0 : index
    %c0_113 = arith.constant 0 : index
    %c12_114 = arith.constant 12 : index
    %c8_115 = arith.constant 8 : index
    %70 = vector.load %arg2[%c0_112, %c0_113, %c12_114, %c8_115] : memref<1x1x16x16xf32, #tpu.memory_space<vmem>>, vector<1x1x4x4xf32>
    %71 = vector.shape_cast %70 : vector<1x1x4x4xf32> to vector<4x4xf32>
    %c0_116 = arith.constant 0 : index
    %c14 = arith.constant 14 : index
    %c0_117 = arith.constant 0 : index
    %c0_118 = arith.constant 0 : index
    %c0_119 = arith.constant 0 : index
    %72 = vector.load %arg3[%c0_116, %c14, %c0_117, %c0_118, %c0_119] : memref<1x16x1x4x4xf32, #tpu.memory_space<vmem>>, vector<1x1x1x4x4xf32>
    %73 = vector.shape_cast %72 : vector<1x1x1x4x4xf32> to vector<4x4xf32>
    %74 = vector.shape_cast %71 : vector<4x4xf32> to vector<1x1x1x4x4xf32>
    tpu.vector_store %arg3[%c0_116, %c14, %c0_117, %c0_118, %c0_119], %74 {strides = array<i32>} : memref<1x16x1x4x4xf32, #tpu.memory_space<vmem>>, vector<1x1x1x4x4xf32>,
    %c0_120 = arith.constant 0 : index
    %c0_121 = arith.constant 0 : index
    %c12_122 = arith.constant 12 : index
    %c12_123 = arith.constant 12 : index
    %75 = vector.load %arg2[%c0_120, %c0_121, %c12_122, %c12_123] : memref<1x1x16x16xf32, #tpu.memory_space<vmem>>, vector<1x1x4x4xf32>
    %76 = vector.shape_cast %75 : vector<1x1x4x4xf32> to vector<4x4xf32>
    %c0_124 = arith.constant 0 : index
    %c15 = arith.constant 15 : index
    %c0_125 = arith.constant 0 : index
    %c0_126 = arith.constant 0 : index
    %c0_127 = arith.constant 0 : index
    %77 = vector.load %arg3[%c0_124, %c15, %c0_125, %c0_126, %c0_127] : memref<1x16x1x4x4xf32, #tpu.memory_space<vmem>>, vector<1x1x1x4x4xf32>
    %78 = vector.shape_cast %77 : vector<1x1x1x4x4xf32> to vector<4x4xf32>
    %79 = vector.shape_cast %76 : vector<4x4xf32> to vector<1x1x1x4x4xf32>
    tpu.vector_store %arg3[%c0_124, %c15, %c0_125, %c0_126, %c0_127], %79 {strides = array<i32>} : memref<1x16x1x4x4xf32, #tpu.memory_space<vmem>>, vector<1x1x1x4x4xf32>,
    return
  }
  func.func @transform_0(%arg0: i32, %arg1: i32) -> (i32, i32, i32, i32) {
    %c0_i32 = arith.constant 0 : i32
    %c0_i32_0 = arith.constant 0 : i32
    %c0_i32_1 = arith.constant 0 : i32
    return %arg0, %arg1, %c0_i32, %c0_i32_0 : i32, i32, i32, i32
  }
  func.func @transform_1(%arg0: i32, %arg1: i32) -> (i32, i32, i32, i32, i32) {
    %c0_i32 = arith.constant 0 : i32
    %c0_i32_0 = arith.constant 0 : i32
    %c0_i32_1 = arith.constant 0 : i32
    %c0_i32_2 = arith.constant 0 : i32
    return %arg0, %c0_i32, %arg1, %c0_i32_0, %c0_i32_1 : i32, i32, i32, i32, i32
  }
}

</mosaic_0001>

<bundles_post_ra>
// kernel: tpu_custom_call.1
= control target key start
LH: loop header
LB: loop body
LE: loop exit
PB: predicated region body
PF: predicated region fallthrough
CT: control target
= control target key end

     0   :  { %6 = vsyncpa [#allocation3], 0  ;;  %s887_s0 = inlined_call_operand.hbm [shape: f32[2,4,16,16], index: 0, kind: input, shape index: {}]   ;;  %s888_s1 = inlined_call_operand.vmem [shape: f32[2,16,4,4,4], index: 1, kind: output, shape index: {}]  }
   0x1   :  { %8 = vsyncpa [#allocation3 + $0x1], 0  ;;  %s654_s6 = smov 0   ;;  %s656_s7 = smov 0  }
   0x2   :  { %s658_s8 = smov 0   ;;  %s660_s9 = smov 0  }
   0x3   :  { %s662_s10 = smov 0   ;;  %s664_s11 = smov 0  }
   0x4   :  { %s666_s12 = smov 0   ;;  %s668_s13 = smov 0  }
   0x5 LB: > { %s433_s14 = sadd.s32 4294967295, %s636_s13   ;;  %s23_s15 = sadd.s32 1, %s628_s11  ;;  %s636_s13 = sphi %s668_s13, %s14_s13   ;;  %s632_s12 = sphi %s666_s12, %s901_s12   ;;  %s628_s11 = sphi %s664_s11, %s900_s11   ;;  %s624_s10 = sphi %s662_s10, %s899_s10   ;;  %s620_s9 = sphi %s660_s9, %s898_s9   ;;  %s616_s8 = sphi %s658_s8, %s897_s8   ;;  %s612_s7 = sphi %s656_s7, %s896_s7   ;;  %s608_s6 = sphi %s654_s6, %s895_s6  }
   0x6   : > { %p24_p0 = scmp.ge.s32.totalorder %s23_s15, 4  ;;  %s26_s16 = sadd.s32 1, %s632_s12 }
   0x7   : > { %s35_s17 = sadd.s32 1, %s616_s8  ;;  %p42_p1 = scmp.ne.s32.totalorder %s616_s8, %s612_s7 }
   0x8   : > { %s903_s15 = smov (%p24_p0, %s23_s15), 0  ;;  %s905_s16 = smov (!%p24_p0, %s26_s16), %s632_s12 }
   0x9   : > { %s31_s18 = ssub.s32 %s628_s11, %s903_s15  ;;  %p43_p2 = scmp.eq.s32.totalorder %s636_s13, 0 }
   0xa   : > { %p28_p3 = scmp.ge.s32.totalorder %s905_s16, 2  ;;  %p48_p4 = scmp.ne.s32.totalorder %s612_s7, %s608_s6 }
   0xb   : > { %p708_p5 = por %p43_p2, %p42_p1  ;;  %p49_p6 = scmp.eq.s32.totalorder %s433_s14, 0 }
   0xc   : > { %s907_s16 = smov (%p28_p3, %s905_s16), 0  ;;  %p74_p8 = scmp.eq.s32.totalorder %s433_s14, 7 }
   0xd   : > { %p714_p7 = por %p49_p6, %p48_p4  ;;  %s30_s21 = ssub.s32 %s632_s12, %s907_s16 }
   0xe   : > { %s32_s22 = sor.u32 %s31_s18, %s30_s21  ;;  %p723_p9 = por %p74_p8, %p42_p1 }
   0xf   : > { %p33_p10 = scmp.eq.s32.totalorder %s32_s22, 0  ;;  %p470_p11 = scmp.lt.s32.totalorder %s636_s13, 8 }
  0x10   : > { %s891_s23 = scalar_select %p723_p9, 1, 0 }
  0x11   : > { %s100_s24 = sand.u32 1, %s616_s8   ;;  %s438_s25 = sshll.u32 %s628_s11, 1 }
  0x12   : > { %s731_s26 = scalar_select %p33_p10, %s616_s8, %s35_s17  }
  0x13   : > { %s437_s27 = sshll.u32 %s100_s24, 4  ;;  %s439_s28 = sshll.u32 %s632_s12, 3 }
  0x14   : > { %s110_s29 = sadd.s32 %s439_s28, %s438_s25  ;;  %s104_s30 = scalar_lea.vmem [#allocation2], %s437_s27 }
  0x15   : > { %s113_s2 = sshll.u32 %s104_s30, 4  ;;  %s440_s3 = sshll.u32 %s110_s29, 7  ;;  %s734_s2 = int_to_ptr.vmem [resolvable:$true] %s113_s2 }
  0x16   : > { %s739_s6 = scalar_lea.hbm %s887_s0, %s440_s3  ;;  %p743_p12 = pnand %p470_p11, %p708_p5 }
  0x17   : > { %s748_s17 = scalar_lea.sflag [#allocation3], %s100_s24  ;;  %s540_s18 = scalar_lea.hbm %s739_s6, 256 }
  0x18   : > { %p541_p0 = scmp.ne.s32.totalorder %s739_s6, %s540_s18  ;;  %p542_p1 = pneg %p743_p12 }
  0x19   : > { %s545_s22 = scalar_lea.hbm %s887_s0, 2048  ;;  %p546_p4 = scmp.lt.u32.totalorder %s739_s6, %s887_s0 }
  0x1a   : > { %p543_p2 = pnand %p542_p1, %p541_p0  ;;  %p547_p5 = scmp.lt.u32.totalorder %s545_s22, %s540_s18 }
  0x1b   : > { %p549_p8 = scmp.lt.u32.totalorder %s540_s18, %s739_s6 }
  0x1c   : > { %p544_p3 = pneg %p543_p2  ;;  %p548_p6 = por %p547_p5, %p546_p4 }
  0x1e   : > { %p550_p10 = por %p549_p8, %p548_p6 }
  0x20   : > { %p551_p11 = pnand %p550_p10, %p544_p3 }
  0x22   : > { %554 = shalt.err (!%p551_p11)
}
  0x23   : > { %s555_s24 = scalar_lea.vmem %s734_s2, 256  ;;  %s638_s28 = smov [#allocation2]  }
  0x24   : > { %p556_p0 = scmp.ne.s32.totalorder %s734_s2, %s555_s24  ;;  %s560_s29 = sshll.u32 %s638_s28, 4  ;;  %s561_s29 = int_to_ptr.vmem [resolvable:$false] %s560_s29 }
  0x25   : > { %s562_s30 = scalar_lea.vmem %s561_s29, 512  ;;  %p563_p9 = scmp.lt.s32.totalorder %s734_s2, %s561_s29 }
  0x26   : > { %p558_p2 = pnand %p556_p0, %p542_p1  ;;  %p564_p4 = scmp.lt.s32.totalorder %s562_s30, %s555_s24 }
  0x28   : > { %p559_p13 = pneg %p558_p2  ;;  %p565_p5 = por %p564_p4, %p563_p9 }
  0x2a   : > { %p566_p6 = pnand %p565_p5, %p559_p13 }
  0x2c   : > { %569 = shalt.err (!%p566_p6)
}
  0x2d   : > { %s639_s3 = smov 128   ;;  %s640_s4 = smov 8  }
  0x2e   : > { %469 = dma.hbm_to_vmem [thread:$0]  (!%p743_p12), %s739_s6, 256, %s734_s2, %s748_s17, %s639_s3, %s639_s3, %s640_s4  }
  0x2f   : > { %p121_p1 = scmp.lt.s32.totalorder %s636_s13, 9  ;;  %p893_p3 = scmp.ge.s32.totalorder %s636_s13, 1 }
  0x31   : > { %p122_p8 = pnand %p893_p3, %p121_p1 }
  0x32   : > { %s127_s5 = sand.u32 (!%p122_p8), 1, %s612_s7  }
  0x33   : > { %125 = sbr.rel (%p122_p8) target bundleno = 205 (0xcd), region = 24  ;;  %s442_s18 = sshll.u32 (!%p122_p8), %s127_s5, 4 }
  0x34   : > { %s128_s19 = scalar_lea.sflag (!%p122_p8), [#allocation3], %s127_s5  ;;  %s780_s21 = scalar_lea.vmem (!%p122_p8), [#allocation2], %s442_s18 }
  0x3a   : > { %603 = dma.done.wait (%p714_p7), %s128_s19, 256  }
  0x3b   : > { %605 = vsyncadd (%p714_p7), %s128_s19, 4294967040  ;;  %v166_v0 = vld [vmem:[%s780_s21] sm:$0xf]  ;;  %s641_s2 = smov 116   ;;  %s642_s6 = smov 124   ;;  %vm150_vm0 = vcmask 27648  }
  0x3c   : > { %v152_v1 = vld [vmem:[%s780_s21] sm:$0xf]  ;;  %168 = vrot.lane.b32.xlu1 %v166_v0, %s641_s2  ;;  %s443_s14 = sshll.u32 %s127_s5, 6  ;;  %v176_v2 = vld [vmem:[%s780_s21 + $0x4] sm:$0xf]  ;;  %s643_s20 = smov 120  }
  0x3d   : > { %154 = vrot.lane.b32.xlu0 %v152_v1, %s642_s6  ;;  %v159_v3 = vld [vmem:[%s780_s21] sm:$0xf]  ;;  %v173_v4 = vld [vmem:[%s780_s21 + $0x4] sm:$0xf]  ;;  %v197_v5 = vld [vmem:[%s780_s21 + $0x8] sm:$0xf] }
  0x3e   : > { %s793_s17 = scalar_lea.vmem [#allocation4], %s443_s14  ;;  %v221_v6 = vld [vmem:[%s780_s21 + $0xc] sm:$0xf]  ;;  %v149_v7 = vld [vmem:[%s780_s21] sm:$0xf]  ;;  %p894_p7 = scmp.ne.s32.totalorder %s891_s23, 0 }
  0x3f   : > { %447 = vst.msk [vmem:[%s793_s17 + $0x10] sm:$0xf] %vm150_vm0, %v173_v4  ;;  %451 = vst.msk [vmem:[%s793_s17 + $0x20] sm:$0xf] %vm150_vm0, %v197_v5  ;;  %v190_v8 = vld [vmem:[%s780_s21 + $0x4] sm:$0xf] }
  0x40   : > { %178 = vrot.lane.b32.xlu1 %v176_v2, %s642_s6  ;;  %v183_v9 = vld [vmem:[%s780_s21 + $0x4] sm:$0xf]  ;;  %455 = vst.msk [vmem:[%s793_s17 + $0x30] sm:$0xf] %vm150_vm0, %v221_v6  ;;  %151 = vst.msk [vmem:[%s793_s17] sm:$0xf] %vm150_vm0, %v149_v7 }
  0x41   : > { %161 = vrot.lane.b32.xlu0 %v159_v3, %s643_s20  ;;  %v207_v10 = vld [vmem:[%s780_s21 + $0x8] sm:$0xf]  ;;  %v224_v12 = vld [vmem:[%s780_s21 + $0xc] sm:$0xf]  ;;  %s460_s22 = sshll.u32 (%p894_p7), %s624_s10, 6 }
  0x42   : > { %v200_v11 = vld [vmem:[%s780_s21 + $0x8] sm:$0xf]  ;;  %v238_v14 = vld [vmem:[%s780_s21 + $0xc] sm:$0xf]  ;;  %s253_s25 = sadd.s32 (%p894_p7), %s620_s9, %s460_s22 }
  0x43   : > { %v214_v13 = vld [vmem:[%s780_s21 + $0x8] sm:$0xf]  ;;  %v231_v15 = vld [vmem:[%s780_s21 + $0xc] sm:$0xf]  ;;  %s461_s23 = sshll.u32 (%p894_p7), %s253_s25, 2 }
  0x44   : > { %192 = vrot.lane.b32.xlu1 %v190_v8, %s641_s2  ;;  %s255_s28 = scalar_lea.vmem (%p894_p7), %s888_s1, %s461_s23 }
  0x45   : > { %185 = vrot.lane.b32.xlu0 %v183_v9, %s643_s20 }
  0x46   : > { %v279_v32 = vld [vmem:[%s793_s17 + $0x10] sm:$0xf] (%p894_p7)  ;;  %v287_v36 = vld [vmem:[%s793_s17 + $0x20] sm:$0xf] (%p894_p7) }
  0x47   : > { %v271_v28 = vld [vmem:[%s793_s17] sm:$0xf] (%p894_p7)  ;;  %280 = vst [vmem:[%s255_s28 + $0x40] sm:$0xf] (%p894_p7), %v279_v32  ;;  %288 = vst [vmem:[%s255_s28 + $0x80] sm:$0xf] (%p894_p7), %v287_v36 }
  0x48   : > { %209 = vrot.lane.b32.xlu1 %v207_v10, %s643_s20  ;;  %272 = vst [vmem:[%s255_s28] sm:$0xf] (%p894_p7), %v271_v28  ;;  %v295_v40 = vld [vmem:[%s793_s17 + $0x30] sm:$0xf] (%p894_p7) }
  0x49   : > { %202 = vrot.lane.b32.xlu0 %v200_v11, %s642_s6  ;;  %296 = vst [vmem:[%s255_s28 + $0xc0] sm:$0xf] (%p894_p7), %v295_v40 }
  0x4c   : > { %226 = vrot.lane.b32.xlu1 %v224_v12, %s642_s6 }
  0x4d   : > { %216 = vrot.lane.b32.xlu0 %v214_v13, %s641_s2 }
  0x50   : > { %240 = vrot.lane.b32.xlu1 %v238_v14, %s641_s2 }
  0x51   : > { %233 = vrot.lane.b32.xlu0 %v231_v15, %s643_s20 }
  0xae   : > { %v169_v16 = vpop.permute.xlu1 %168 }
  0xaf   : > { %v155_v17 = vpop.permute.xlu0 %154  ;;  %446 = vst.msk [vmem:[%s793_s17 + $0xc] sm:$0xf] %vm150_vm0, %v169_v16 }
  0xb0   : > { %444 = vst.msk [vmem:[%s793_s17 + $0x4] sm:$0xf] %vm150_vm0, %v155_v17 }
  0xb2   : > { %v179_v18 = vpop.permute.xlu1 %178 }
  0xb3   : > { %v162_v19 = vpop.permute.xlu0 %161  ;;  %448 = vst.msk [vmem:[%s793_s17 + $0x14] sm:$0xf] %vm150_vm0, %v179_v18 }
  0xb4   : > { %445 = vst.msk [vmem:[%s793_s17 + $0x8] sm:$0xf] %vm150_vm0, %v162_v19 }
  0xb6   : > { %v193_v20 = vpop.permute.xlu1 %192  ;;  %v277_v31 = vld [vmem:[%s793_s17 + $0xc] sm:$0xf] (%p894_p7) }
  0xb7   : > { %v186_v21 = vpop.permute.xlu0 %185  ;;  %450 = vst.msk [vmem:[%s793_s17 + $0x1c] sm:$0xf] %vm150_vm0, %v193_v20  ;;  %v273_v29 = vld [vmem:[%s793_s17 + $0x4] sm:$0xf] (%p894_p7)  ;;  %278 = vst [vmem:[%s255_s28 + $0x30] sm:$0xf] (%p894_p7), %v277_v31 }
  0xb8   : > { %449 = vst.msk [vmem:[%s793_s17 + $0x18] sm:$0xf] %vm150_vm0, %v186_v21  ;;  %274 = vst [vmem:[%s255_s28 + $0x10] sm:$0xf] (%p894_p7), %v273_v29 }
  0xba   : > { %v210_v22 = vpop.permute.xlu1 %209  ;;  %v281_v33 = vld [vmem:[%s793_s17 + $0x14] sm:$0xf] (%p894_p7) }
  0xbb   : > { %v203_v23 = vpop.permute.xlu0 %202  ;;  %453 = vst.msk [vmem:[%s793_s17 + $0x28] sm:$0xf] %vm150_vm0, %v210_v22  ;;  %v275_v30 = vld [vmem:[%s793_s17 + $0x8] sm:$0xf] (%p894_p7)  ;;  %282 = vst [vmem:[%s255_s28 + $0x50] sm:$0xf] (%p894_p7), %v281_v33 }
  0xbc   : > { %452 = vst.msk [vmem:[%s793_s17 + $0x24] sm:$0xf] %vm150_vm0, %v203_v23  ;;  %276 = vst [vmem:[%s255_s28 + $0x20] sm:$0xf] (%p894_p7), %v275_v30 }
  0xbe   : > { %v227_v24 = vpop.permute.xlu1 %226  ;;  %251 = sbr.rel (!%p894_p7) target bundleno = 205 (0xcd), region = 32  ;;  %v285_v35 = vld [vmem:[%s793_s17 + $0x1c] sm:$0xf] (%p894_p7) }
  0xbf   : > { %v217_v25 = vpop.permute.xlu0 %216  ;;  %456 = vst.msk [vmem:[%s793_s17 + $0x34] sm:$0xf] %vm150_vm0, %v227_v24  ;;  %v283_v34 = vld [vmem:[%s793_s17 + $0x18] sm:$0xf] (%p894_p7)  ;;  %286 = vst [vmem:[%s255_s28 + $0x70] sm:$0xf] (%p894_p7), %v285_v35 }
  0xc0   : > { %454 = vst.msk [vmem:[%s793_s17 + $0x2c] sm:$0xf] %vm150_vm0, %v217_v25  ;;  %284 = vst [vmem:[%s255_s28 + $0x60] sm:$0xf] (%p894_p7), %v283_v34 }
  0xc2   : > { %v241_v26 = vpop.permute.xlu1 %240  ;;  %v291_v38 = vld [vmem:[%s793_s17 + $0x28] sm:$0xf] (%p894_p7) }
  0xc3   : > { %v234_v27 = vpop.permute.xlu0 %233  ;;  %458 = vst.msk [vmem:[%s793_s17 + $0x3c] sm:$0xf] %vm150_vm0, %v241_v26  ;;  %v289_v37 = vld [vmem:[%s793_s17 + $0x24] sm:$0xf] (%p894_p7)  ;;  %292 = vst [vmem:[%s255_s28 + $0xa0] sm:$0xf] (%p894_p7), %v291_v38 }
  0xc4   : > { %457 = vst.msk [vmem:[%s793_s17 + $0x38] sm:$0xf] %vm150_vm0, %v234_v27  ;;  %290 = vst [vmem:[%s255_s28 + $0x90] sm:$0xf] (%p894_p7), %v289_v37 }
  0xc6   : > { %v297_v41 = vld [vmem:[%s793_s17 + $0x34] sm:$0xf] }
  0xc7   : > { %v293_v39 = vld [vmem:[%s793_s17 + $0x2c] sm:$0xf]  ;;  %298 = vst [vmem:[%s255_s28 + $0xd0] sm:$0xf] %v297_v41 }
  0xc8   : > { %294 = vst [vmem:[%s255_s28 + $0xb0] sm:$0xf] %v293_v39 }
  0xca   : > { %v301_v43 = vld [vmem:[%s793_s17 + $0x3c] sm:$0xf] }
  0xcb   : > { %v299_v42 = vld [vmem:[%s793_s17 + $0x38] sm:$0xf]  ;;  %302 = vst [vmem:[%s255_s28 + $0xf0] sm:$0xf] %v301_v43 }
  0xcc   : > { %300 = vst [vmem:[%s255_s28 + $0xe0] sm:$0xf] %v299_v42 }
  0xcd PF: > { %s14_s13 = sadd.s32 1, %s636_s13   ;;  %s895_s6 = smov %s612_s7 }
  0xce   : > { %p11_p9 = scmp.ge.s32.totalorder %s14_s13, 10   ;;  %s896_s7 = smov %s616_s8 }
  0xcf   : > { %s897_s8 = smov %s731_s26  ;;  %s898_s9 = smov %s628_s11 }
  0xd0   : > { %s899_s10 = smov %s632_s12  ;;  %s900_s11 = smov %s903_s15 }
  0xd1   : > { %s901_s12 = smov %s907_s16  ;;  %13 = sbr.rel (!%p11_p9) target bundleno = 5 (0x5), region = 120 }
  0xd8   :  { %367 = vsyncpa [#allocation3], 1 }
  0xd9   :  { %369 = vsyncpa [#allocation3 + $0x1], 1 }

</bundles_post_ra>
